<compile_context>
chip_gen: v7x
topology: tpu7x:2x2x1
jax: 0.10.0
libtpu: 0.0.40
codegen_flags: <defaults>
</compile_context>

<pallas_src>
import functools

import jax
import jax.numpy as jnp
import numpy as np
from jax import lax
from jax.experimental import pallas as pl
from jax.experimental.pallas import tpu as pltpu

# Model hyper-parameters (nn.Module __init__ defaults, scaled to small shapes).
N_DIM = 4          # n_dim
M_DIM = 4          # m_dim
HID = 32           # num_layers
RECON_SIGMA = 1.0  # recon_sigma
REG_WEIGHT = 1.0   # reg_weight
BATCH = 8
# sample_size_for_integral = 1  -> single pass.

LANES = 128
# Row layout of the packed (W_ROWS, 128) weight slabs (sublane-aligned blocks).
ROW_L1 = 0              # first linear  : rows [0, 8)   (only first N_DIM/M_DIM rows used)
ROW_L2 = 8              # second linear : rows [8, 8+HID)
ROW_L3 = 8 + HID        # heads / third : rows [40, 40+HID)
W_ROWS = ROW_L3 + HID   # 72 (multiple of 8)

# Column layout of the per-sample (B, 128) slabs.
MU_LO = 0               # enc slab: mu  cols [0, M_DIM)
VAR_LO = M_DIM          #           var cols [M_DIM, 2*M_DIM)
NU_COL = 2 * M_DIM      #           nu  col  2*M_DIM
V_COL = NU_COL + 1      #           v   col  2*M_DIM+1 (Chi2 draw, host-injected)
X_LO = 0                # data slab: x   cols [0, N_DIM)
EPS_LO = 8              #            eps cols [8, 8+M_DIM)


def _softplus(x):
    # numerically stable softplus, matches torch.nn.Softplus
    return jnp.maximum(x, 0.0) + jnp.log1p(jnp.exp(-jnp.abs(x)))


def _leaky_relu(x):
    return jnp.where(x > 0, x, 0.01 * x)  # torch default negative_slope=0.01


# --------------------------------------------------------------------------
# Kernel 1: fused encoder  data_slab -> [mu | var | nu] slab (lane-dense)
# --------------------------------------------------------------------------
def _encode_kernel(data_ref, w_ref, b_ref, enc_ref):
    xs = data_ref[...]                                          # (TB, 128)
    # layer 1: x @ W1 + b1 -> tanh   (W1 in rows 0:8, rows >= N_DIM are zero)
    h = jnp.tanh(
        jnp.dot(xs[:, 0:ROW_L2], w_ref[ROW_L1:ROW_L2, :],
                preferred_element_type=jnp.float32) + b_ref[0:1, :])
    # layer 2
    h = jnp.tanh(
        jnp.dot(h[:, 0:HID], w_ref[ROW_L2:ROW_L3, :],
                preferred_element_type=jnp.float32) + b_ref[1:2, :])
    # packed heads: one matmul -> [mu | var_raw | nu_raw] in cols 0:2*M_DIM+1
    raw = jnp.dot(h[:, 0:HID], w_ref[ROW_L3:W_ROWS, :],
                  preferred_element_type=jnp.float32) + b_ref[2:3, :]
    sp = _softplus(raw)
    col = lax.broadcasted_iota(jnp.int32, raw.shape, 1)
    enc_ref[...] = jnp.where(
        col < VAR_LO, raw,                                      # mu
        jnp.where(col < NU_COL, sp,                             # var = softplus
                  jnp.where(col == NU_COL, sp + 3.0,            # nu  = softplus + 3
                            jnp.zeros_like(raw))))


# --------------------------------------------------------------------------
# Kernel 2: reparameterize + decoder + per-row loss partials (lane-dense)
# --------------------------------------------------------------------------
def _decode_loss_kernel(data_ref, enc_ref, w_ref, b_ref, out_ref, *, inv_b):
    data = data_ref[...]                                        # (TB, 128)
    enc = enc_ref[...]                                          # (TB, 128)
    x = data[:, X_LO:X_LO + N_DIM]                              # (TB, N_DIM)
    eps = data[:, EPS_LO:EPS_LO + M_DIM]                        # (TB, M_DIM)
    mu = enc[:, MU_LO:MU_LO + M_DIM]
    var = enc[:, VAR_LO:VAR_LO + M_DIM]
    nu = enc[:, NU_COL:NU_COL + 1]                              # (TB, 1)
    v = enc[:, V_COL:V_COL + 1]                                 # (TB, 1) Chi2(nu) draw

    # encoder_reparameterize: z = mu + sqrt(var) * eps * sqrt(nu / v)
    z = mu + jnp.sqrt(var) * eps * jnp.sqrt(nu / v)

    # decode: Linear -> LeakyReLU -> Linear -> LeakyReLU -> Linear
    h = _leaky_relu(
        jnp.dot(z, w_ref[ROW_L1:ROW_L1 + M_DIM, :],
                preferred_element_type=jnp.float32) + b_ref[0:1, :])
    h = _leaky_relu(
        jnp.dot(h[:, 0:HID], w_ref[ROW_L2:ROW_L3, :],
                preferred_element_type=jnp.float32) + b_ref[1:2, :])
    mu_theta = (jnp.dot(h[:, 0:HID], w_ref[ROW_L3:W_ROWS, :],
                        preferred_element_type=jnp.float32)
                + b_ref[2:3, :])[:, 0:N_DIM]                    # (TB, N_DIM)

    # per-row loss contributions, pre-scaled by 1/B (wrapper only sums rows).
    recon_row = jnp.sum((mu_theta - x) ** 2, axis=1, keepdims=True) \
        * (inv_b / (RECON_SIGMA ** 2))                          # (TB, 1)
    # TODO(synk): pl.reciprocal(var, approx=True) would move the divide to the
    # EUP, but its relaxed precision breaks the 1e-4 check; keep exact divide.
    q1 = jnp.sum((z - mu) ** 2 / var, axis=1, keepdims=True)
    q2 = jnp.sum(z * z, axis=1, keepdims=True)
    logvar_sum = jnp.sum(jnp.log(var), axis=1, keepdims=True)
    reg_row = (-logvar_sum
               - (nu + M_DIM) * jnp.log(nu + q1)
               + (nu + M_DIM) * jnp.log(nu + q2)) * inv_b       # (TB, 1)

    col = lax.broadcasted_iota(jnp.int32, data.shape, 1)
    out_ref[...] = jnp.where(col == 0, recon_row,
                             jnp.where(col == 1, reg_row, jnp.zeros_like(data)))


# --------------------------------------------------------------------------
# pallas_call wrappers
# --------------------------------------------------------------------------
def _batch_tile(b):
    tb = b if b <= 128 else 128
    assert b % tb == 0, "batch must be a multiple of the batch tile"
    return tb


def encode(data_slab, enc_w, enc_b):
    b = data_slab.shape[0]
    tb = _batch_tile(b)
    return pl.pallas_call(
        _encode_kernel,
        grid=(b // tb,),
        in_specs=[pl.BlockSpec((tb, LANES), lambda i: (i, 0)),
                  pl.BlockSpec((W_ROWS, LANES), lambda i: (0, 0)),
                  pl.BlockSpec((8, LANES), lambda i: (0, 0))],
        out_specs=pl.BlockSpec((tb, LANES), lambda i: (i, 0)),
        out_shape=jax.ShapeDtypeStruct((b, LANES), jnp.float32),
        compiler_params=pltpu.CompilerParams(dimension_semantics=("parallel",)),
    )(data_slab, enc_w, enc_b)


def decode_and_losses(data_slab, enc_slab, dec_w, dec_b):
    b = data_slab.shape[0]
    tb = _batch_tile(b)
    kernel = functools.partial(_decode_loss_kernel, inv_b=1.0 / b)
    return pl.pallas_call(
        kernel,
        grid=(b // tb,),
        in_specs=[pl.BlockSpec((tb, LANES), lambda i: (i, 0)),
                  pl.BlockSpec((tb, LANES), lambda i: (i, 0)),
                  pl.BlockSpec((W_ROWS, LANES), lambda i: (0, 0)),
                  pl.BlockSpec((8, LANES), lambda i: (0, 0))],
        out_specs=pl.BlockSpec((tb, LANES), lambda i: (i, 0)),
        out_shape=jax.ShapeDtypeStruct((b, LANES), jnp.float32),
        compiler_params=pltpu.CompilerParams(dimension_semantics=("parallel",)),
    )(data_slab, enc_slab, dec_w, dec_b)


@jax.jit
def vae_st_forward(x, enc_w, enc_b, dec_w, dec_b, key):
    """Forward pass: returns (mean_recon, mean_reg, mean_total, aux)."""
    b = x.shape[0]
    k_eps, k_v = jax.random.split(key)
    eps = jax.random.normal(k_eps, (b, M_DIM), dtype=jnp.float32)
    # TODO(synk): eps could be generated in-kernel (pltpu.prng_seed +
    # prng_random_bits + Box-Muller); kept on host so the pure-JAX reference
    # can reuse the exact same draw (it is packed into the slab, no extra DMA).

    # Single lane-dense (B, 128) input slab: [x | eps], shared by both kernels.
    data_slab = jnp.zeros((b, LANES), jnp.float32)
    data_slab = data_slab.at[:, X_LO:X_LO + N_DIM].set(x)
    data_slab = data_slab.at[:, EPS_LO:EPS_LO + M_DIM].set(eps)

    enc_slab = encode(data_slab, enc_w, enc_b)          # [mu | var | nu | 0 ...]
    nu = enc_slab[:, NU_COL]

    # TODO(synk): Chi2(nu) with data-dependent nu needs rejection sampling; the
    # draw stays in host JAX (this is also what prevents fusing the two kernels).
    v = 2.0 * jax.random.gamma(k_v, nu / 2.0, dtype=jnp.float32)
    enc_slab_v = enc_slab.at[:, V_COL].set(v)

    out = decode_and_losses(data_slab, enc_slab_v, dec_w, dec_b)  # (B, 128)
    recon = jnp.sum(out[:, 0])          # per-row partials are already / (B*sigma^2)
    reg = jnp.sum(out[:, 1])
    total = recon + REG_WEIGHT * reg
    aux = (enc_slab[:, MU_LO:MU_LO + M_DIM],
           enc_slab[:, VAR_LO:VAR_LO + M_DIM],
           enc_slab[:, NU_COL:NU_COL + 1],
           eps, v[:, None])
    return recon, reg, total, aux


# --------------------------------------------------------------------------
# Parameter init (PyTorch-like uniform(-1/sqrt(fan_in), ...)) + slab packing
# --------------------------------------------------------------------------
def _init_linear(key, fan_in, fan_out):
    kw, kb = jax.random.split(key)
    bound = 1.0 / float(np.sqrt(fan_in))
    w = jax.random.uniform(kw, (fan_in, fan_out), jnp.float32, -bound, bound)
    b = jax.random.uniform(kb, (fan_out,), jnp.float32, -bound, bound)
    return w, b


def init_params(key):
    keys = jax.random.split(key, 8)
    w1, b1 = _init_linear(keys[0], N_DIM, HID)      # encoder[0]
    w2, b2 = _init_linear(keys[1], HID, HID)        # encoder[2]
    wmu, bmu = _init_linear(keys[2], HID, M_DIM)    # latent_mu
    wvar, bvar = _init_linear(keys[3], HID, M_DIM)  # latent_var[0]
    wnu, bnu = _init_linear(keys[4], HID, 1)        # latent_nu[0]
    wd1, bd1 = _init_linear(keys[5], M_DIM, HID)    # decoder[0]
    wd2, bd2 = _init_linear(keys[6], HID, HID)      # decoder[2]
    wd3, bd3 = _init_linear(keys[7], HID, N_DIM)    # decoder[4]
    enc = (w1, b1, w2, b2, wmu, bmu, wvar, bvar, wnu, bnu)
    dec = (wd1, bd1, wd2, bd2, wd3, bd3)
    return enc, dec


def pack_encoder_params(enc):
    w1, b1, w2, b2, wmu, bmu, wvar, bvar, wnu, bnu = enc
    w = jnp.zeros((W_ROWS, LANES), jnp.float32)
    w = w.at[ROW_L1:ROW_L1 + N_DIM, 0:HID].set(w1)
    w = w.at[ROW_L2:ROW_L2 + HID, 0:HID].set(w2)
    w = w.at[ROW_L3:ROW_L3 + HID, MU_LO:MU_LO + M_DIM].set(wmu)
    w = w.at[ROW_L3:ROW_L3 + HID, VAR_LO:VAR_LO + M_DIM].set(wvar)
    w = w.at[ROW_L3:ROW_L3 + HID, NU_COL:NU_COL + 1].set(wnu)
    b = jnp.zeros((8, LANES), jnp.float32)
    b = b.at[0, 0:HID].set(b1)
    b = b.at[1, 0:HID].set(b2)
    b = b.at[2, MU_LO:MU_LO + M_DIM].set(bmu)
    b = b.at[2, VAR_LO:VAR_LO + M_DIM].set(bvar)
    b = b.at[2, NU_COL].set(bnu[0])
    return w, b


def pack_decoder_params(dec):
    wd1, bd1, wd2, bd2, wd3, bd3 = dec
    w = jnp.zeros((W_ROWS, LANES), jnp.float32)
    w = w.at[ROW_L1:ROW_L1 + M_DIM, 0:HID].set(wd1)
    w = w.at[ROW_L2:ROW_L2 + HID, 0:HID].set(wd2)
    w = w.at[ROW_L3:ROW_L3 + HID, 0:N_DIM].set(wd3)
    b = jnp.zeros((8, LANES), jnp.float32)
    b = b.at[0, 0:HID].set(bd1)
    b = b.at[1, 0:HID].set(bd2)
    b = b.at[2, 0:N_DIM].set(bd3)
    return w, b


# --------------------------------------------------------------------------
# Pure-JAX reference (for correctness check of the kernels)
# --------------------------------------------------------------------------
def reference_forward(x, enc, dec, eps, v):
    w1, b1, w2, b2, wmu, bmu, wvar, bvar, wnu, bnu = enc
    wd1, bd1, wd2, bd2, wd3, bd3 = dec
    h = jnp.tanh(x @ w1 + b1)
    h = jnp.tanh(h @ w2 + b2)
    mu = h @ wmu + bmu
    var = _softplus(h @ wvar + bvar)
    nu = _softplus(h @ wnu + bnu) + 3.0           # (B, 1)
    z = mu + jnp.sqrt(var) * eps * jnp.sqrt(nu / v)
    d = _leaky_relu(z @ wd1 + bd1)
    d = _leaky_relu(d @ wd2 + bd2)
    mu_theta = d @ wd3 + bd3
    recon = jnp.mean(jnp.sum((mu_theta - x) ** 2, axis=1)) / RECON_SIGMA ** 2
    nu_f = nu[:, 0]
    reg = (-jnp.sum(jnp.log(var), axis=1)
           - (nu_f + M_DIM) * jnp.log(nu_f + jnp.sum((z - mu) ** 2 / var, axis=1))
           + (nu_f + M_DIM) * jnp.log(nu_f + jnp.sum(z ** 2, axis=1)))
    reg = jnp.mean(reg)
    return recon, reg, recon + REG_WEIGHT * reg, mu, var, nu


if __name__ == "__main__":
    root = jax.random.PRNGKey(0)
    k_param, k_x, k_noise = jax.random.split(root, 3)

    enc_params, dec_params = init_params(k_param)
    enc_w, enc_b = pack_encoder_params(enc_params)
    dec_w, dec_b = pack_decoder_params(dec_params)
    x = jax.random.normal(k_x, (BATCH, N_DIM), dtype=jnp.float32)

    recon, reg, total, (mu, var, nu, eps, v) = vae_st_forward(
        x, enc_w, enc_b, dec_w, dec_b, k_noise)
    jax.block_until_ready((recon, reg, total))

    # check against pure-JAX reference using the same eps / v draws
    r_recon, r_reg, r_total, r_mu, r_var, r_nu = reference_forward(
        x, enc_params, dec_params, eps, v)

    np.testing.assert_allclose(np.asarray(mu), np.asarray(r_mu), rtol=1e-4, atol=1e-5)
    np.testing.assert_allclose(np.asarray(var), np.asarray(r_var), rtol=1e-4, atol=1e-5)
    np.testing.assert_allclose(np.asarray(nu), np.asarray(r_nu), rtol=1e-4, atol=1e-5)
    np.testing.assert_allclose(float(recon), float(r_recon), rtol=1e-4, atol=1e-4)
    np.testing.assert_allclose(float(reg), float(r_reg), rtol=1e-4, atol=1e-4)
    np.testing.assert_allclose(float(total), float(r_total), rtol=1e-4, atol=1e-4)

    print("KERNEL_OK")
</pallas_src>

<mosaic_0001>
module attributes {stable_mosaic.version = 11 : i64} {
  func.func @_encode_kernel(%arg0: i32, %arg1: memref<8x128xf32, #tpu.memory_space<vmem>>, %arg2: memref<72x128xf32, #tpu.memory_space<vmem>>, %arg3: memref<8x128xf32, #tpu.memory_space<vmem>>, %arg4: memref<8x128xf32, #tpu.memory_space<vmem>>) attributes {dimension_semantics = [#tpu.dimension_semantics<parallel>], iteration_bounds = array<i64: 1>, scalar_prefetch = 0 : i64, scratch_operands = 0 : i64, tpu.core_type = #tpu.core_type<tc>, window_params = [{transform_indices = @transform_0, window_bounds = array<i64: 8, 128>}, {pipeline_mode = #tpu.pipeline_mode<synchronous>, transform_indices = @transform_1, window_bounds = array<i64: 72, 128>}, {pipeline_mode = #tpu.pipeline_mode<synchronous>, transform_indices = @transform_2, window_bounds = array<i64: 8, 128>}, {transform_indices = @transform_3, window_bounds = array<i64: 8, 128>}]} {
    %c0 = arith.constant 0 : index
    %c0_0 = arith.constant 0 : index
    %0 = vector.load %arg1[%c0, %c0_0] : memref<8x128xf32, #tpu.memory_space<vmem>>, vector<8x128xf32>
    %1 = vector.extract_strided_slice %0 {offsets = [0, 0], sizes = [8, 8], strides = [1, 1]} : vector<8x128xf32> to vector<8x8xf32>
    %c0_1 = arith.constant 0 : index
    %c0_2 = arith.constant 0 : index
    %2 = vector.load %arg2[%c0_1, %c0_2] : memref<72x128xf32, #tpu.memory_space<vmem>>, vector<8x128xf32>
    %cst = arith.constant dense<0.000000e+00> : vector<8x128xf32>
    %3 = tpu.matmul %1, %2, %cst {dimension_numbers = #tpu.dot_dimension_numbers<[1], [0], [0], [1], [0, 0, 1, 1], [], []>} : vector<8x8xf32>, vector<8x128xf32>, vector<8x128xf32> -> vector<8x128xf32>
    %c0_3 = arith.constant 0 : index
    %c0_4 = arith.constant 0 : index
    %4 = vector.load %arg3[%c0_3, %c0_4] : memref<8x128xf32, #tpu.memory_space<vmem>>, vector<1x128xf32>
    %5 = vector.broadcast %4 : vector<1x128xf32> to vector<8x128xf32>
    %6 = arith.addf %3, %5 : vector<8x128xf32>
    %7 = math.tanh %6 : vector<8x128xf32>
    %8 = vector.extract_strided_slice %7 {offsets = [0, 0], sizes = [8, 32], strides = [1, 1]} : vector<8x128xf32> to vector<8x32xf32>
    %c8 = arith.constant 8 : index
    %c0_5 = arith.constant 0 : index
    %9 = vector.load %arg2[%c8, %c0_5] : memref<72x128xf32, #tpu.memory_space<vmem>>, vector<32x128xf32>
    %cst_6 = arith.constant dense<0.000000e+00> : vector<8x128xf32>
    %10 = tpu.matmul %8, %9, %cst_6 {dimension_numbers = #tpu.dot_dimension_numbers<[1], [0], [0], [1], [0, 0, 1, 1], [], []>} : vector<8x32xf32>, vector<32x128xf32>, vector<8x128xf32> -> vector<8x128xf32>
    %c1 = arith.constant 1 : index
    %c0_7 = arith.constant 0 : index
    %11 = vector.load %arg3[%c1, %c0_7] : memref<8x128xf32, #tpu.memory_space<vmem>>, vector<1x128xf32>
    %12 = vector.broadcast %11 : vector<1x128xf32> to vector<8x128xf32>
    %13 = arith.addf %10, %12 : vector<8x128xf32>
    %14 = math.tanh %13 : vector<8x128xf32>
    %15 = vector.extract_strided_slice %14 {offsets = [0, 0], sizes = [8, 32], strides = [1, 1]} : vector<8x128xf32> to vector<8x32xf32>
    %c40 = arith.constant 40 : index
    %c0_8 = arith.constant 0 : index
    %16 = vector.load %arg2[%c40, %c0_8] : memref<72x128xf32, #tpu.memory_space<vmem>>, vector<32x128xf32>
    %cst_9 = arith.constant dense<0.000000e+00> : vector<8x128xf32>
    %17 = tpu.matmul %15, %16, %cst_9 {dimension_numbers = #tpu.dot_dimension_numbers<[1], [0], [0], [1], [0, 0, 1, 1], [], []>} : vector<8x32xf32>, vector<32x128xf32>, vector<8x128xf32> -> vector<8x128xf32>
    %c2 = arith.constant 2 : index
    %c0_10 = arith.constant 0 : index
    %18 = vector.load %arg3[%c2, %c0_10] : memref<8x128xf32, #tpu.memory_space<vmem>>, vector<1x128xf32>
    %19 = vector.broadcast %18 : vector<1x128xf32> to vector<8x128xf32>
    %20 = arith.addf %17, %19 : vector<8x128xf32>
    %cst_11 = arith.constant 0.000000e+00 : f32
    %21 = vector.broadcast %cst_11 : f32 to vector<8x128xf32>
    %22 = arith.maximumf %20, %21 : vector<8x128xf32>
    %23 = math.absf %20 : vector<8x128xf32>
    %cst_12 = arith.constant 0.000000e+00 : f32
    %24 = vector.broadcast %cst_12 : f32 to vector<8x128xf32>
    %25 = arith.subf %24, %23 : vector<8x128xf32>
    %26 = math.exp %25 : vector<8x128xf32>
    %27 = math.log1p %26 : vector<8x128xf32>
    %28 = arith.addf %22, %27 : vector<8x128xf32>
    %29 = tpu.iota {dimensions = array<i32: 1>} : vector<8x128xi32>
    %c4_i32 = arith.constant 4 : i32
    %30 = vector.broadcast %c4_i32 : i32 to vector<8x128xi32>
    %31 = arith.cmpi slt, %29, %30 : vector<8x128xi32>
    %c8_i32 = arith.constant 8 : i32
    %32 = vector.broadcast %c8_i32 : i32 to vector<8x128xi32>
    %33 = arith.cmpi slt, %29, %32 : vector<8x128xi32>
    %c8_i32_13 = arith.constant 8 : i32
    %34 = vector.broadcast %c8_i32_13 : i32 to vector<8x128xi32>
    %35 = arith.cmpi eq, %29, %34 : vector<8x128xi32>
    %cst_14 = arith.constant 3.000000e+00 : f32
    %36 = vector.broadcast %cst_14 : f32 to vector<8x128xf32>
    %37 = arith.addf %28, %36 : vector<8x128xf32>
    %cst_15 = arith.constant 0.000000e+00 : f32
    %38 = vector.broadcast %cst_15 : f32 to vector<8x128xf32>
    %39 = arith.select %35, %37, %38 : vector<8x128xi1>, vector<8x128xf32>
    %40 = arith.select %33, %28, %39 : vector<8x128xi1>, vector<8x128xf32>
    %41 = arith.select %31, %20, %40 : vector<8x128xi1>, vector<8x128xf32>
    %c0_16 = arith.constant 0 : index
    %c0_17 = arith.constant 0 : index
    %42 = vector.load %arg4[%c0_16, %c0_17] : memref<8x128xf32, #tpu.memory_space<vmem>>, vector<8x128xf32>
    tpu.vector_store %arg4[%c0_16, %c0_17], %41 {strides = array<i32>} : memref<8x128xf32, #tpu.memory_space<vmem>>, vector<8x128xf32>,
    return
  }
  func.func @transform_0(%arg0: i32) -> (i32, i32) {
    %c0_i32 = arith.constant 0 : i32
    %c0_i32_0 = arith.constant 0 : i32
    return %arg0, %c0_i32 : i32, i32
  }
  func.func @transform_1(%arg0: i32) -> (i32, i32) {
    %c0_i32 = arith.constant 0 : i32
    %c0_i32_0 = arith.constant 0 : i32
    %c0_i32_1 = arith.constant 0 : i32
    return %c0_i32, %c0_i32_0 : i32, i32
  }
  func.func @transform_2(%arg0: i32) -> (i32, i32) {
    %c0_i32 = arith.constant 0 : i32
    %c0_i32_0 = arith.constant 0 : i32
    %c0_i32_1 = arith.constant 0 : i32
    return %c0_i32, %c0_i32_0 : i32, i32
  }
  func.func @transform_3(%arg0: i32) -> (i32, i32) {
    %c0_i32 = arith.constant 0 : i32
    %c0_i32_0 = arith.constant 0 : i32
    return %arg0, %c0_i32 : i32, i32
  }
}

module attributes {stable_mosaic.version = 11 : i64} {
  func.func @_decode_loss_kernel(%arg0: i32, %arg1: memref<8x128xf32, #tpu.memory_space<vmem>>, %arg2: memref<8x128xf32, #tpu.memory_space<vmem>>, %arg3: memref<72x128xf32, #tpu.memory_space<vmem>>, %arg4: memref<8x128xf32, #tpu.memory_space<vmem>>, %arg5: memref<8x128xf32, #tpu.memory_space<vmem>>) attributes {dimension_semantics = [#tpu.dimension_semantics<parallel>], iteration_bounds = array<i64: 1>, scalar_prefetch = 0 : i64, scratch_operands = 0 : i64, tpu.core_type = #tpu.core_type<tc>, window_params = [{transform_indices = @transform_0, window_bounds = array<i64: 8, 128>}, {transform_indices = @transform_1, window_bounds = array<i64: 8, 128>}, {pipeline_mode = #tpu.pipeline_mode<synchronous>, transform_indices = @transform_2, window_bounds = array<i64: 72, 128>}, {pipeline_mode = #tpu.pipeline_mode<synchronous>, transform_indices = @transform_3, window_bounds = array<i64: 8, 128>}, {transform_indices = @transform_4, window_bounds = array<i64: 8, 128>}]} {
    %c0 = arith.constant 0 : index
    %c0_0 = arith.constant 0 : index
    %0 = vector.load %arg1[%c0, %c0_0] : memref<8x128xf32, #tpu.memory_space<vmem>>, vector<8x128xf32>
    %c0_1 = arith.constant 0 : index
    %c0_2 = arith.constant 0 : index
    %1 = vector.load %arg2[%c0_1, %c0_2] : memref<8x128xf32, #tpu.memory_space<vmem>>, vector<8x128xf32>
    %2 = vector.extract_strided_slice %0 {offsets = [0, 0], sizes = [8, 4], strides = [1, 1]} : vector<8x128xf32> to vector<8x4xf32>
    %3 = vector.extract_strided_slice %0 {offsets = [0, 8], sizes = [8, 4], strides = [1, 1]} : vector<8x128xf32> to vector<8x4xf32>
    %4 = vector.extract_strided_slice %1 {offsets = [0, 0], sizes = [8, 4], strides = [1, 1]} : vector<8x128xf32> to vector<8x4xf32>
    %5 = vector.extract_strided_slice %1 {offsets = [0, 4], sizes = [8, 4], strides = [1, 1]} : vector<8x128xf32> to vector<8x4xf32>
    %6 = vector.extract_strided_slice %1 {offsets = [0, 8], sizes = [8, 1], strides = [1, 1]} : vector<8x128xf32> to vector<8x1xf32>
    %7 = vector.extract_strided_slice %1 {offsets = [0, 9], sizes = [8, 1], strides = [1, 1]} : vector<8x128xf32> to vector<8x1xf32>
    %8 = math.sqrt %5 : vector<8x4xf32>
    %9 = arith.mulf %8, %3 : vector<8x4xf32>
    %10 = arith.divf %6, %7 : vector<8x1xf32>
    %11 = math.sqrt %10 : vector<8x1xf32>
    %12 = vector.broadcast %11 : vector<8x1xf32> to vector<8x4xf32>
    %13 = arith.mulf %9, %12 : vector<8x4xf32>
    %14 = arith.addf %4, %13 : vector<8x4xf32>
    %c0_3 = arith.constant 0 : index
    %c0_4 = arith.constant 0 : index
    %15 = vector.load %arg3[%c0_3, %c0_4] : memref<72x128xf32, #tpu.memory_space<vmem>>, vector<4x128xf32>
    %cst = arith.constant dense<0.000000e+00> : vector<8x128xf32>
    %16 = tpu.matmul %14, %15, %cst {dimension_numbers = #tpu.dot_dimension_numbers<[1], [0], [0], [1], [0, 0, 1, 1], [], []>} : vector<8x4xf32>, vector<4x128xf32>, vector<8x128xf32> -> vector<8x128xf32>
    %c0_5 = arith.constant 0 : index
    %c0_6 = arith.constant 0 : index
    %17 = vector.load %arg4[%c0_5, %c0_6] : memref<8x128xf32, #tpu.memory_space<vmem>>, vector<1x128xf32>
    %18 = vector.broadcast %17 : vector<1x128xf32> to vector<8x128xf32>
    %19 = arith.addf %16, %18 : vector<8x128xf32>
    %cst_7 = arith.constant 0.000000e+00 : f32
    %20 = vector.broadcast %cst_7 : f32 to vector<8x128xf32>
    %21 = arith.cmpf ogt, %19, %20 : vector<8x128xf32>
    %cst_8 = arith.constant 0.00999999977 : f32
    %22 = vector.broadcast %cst_8 : f32 to vector<8x128xf32>
    %23 = arith.mulf %22, %19 : vector<8x128xf32>
    %24 = arith.select %21, %19, %23 : vector<8x128xi1>, vector<8x128xf32>
    %25 = vector.extract_strided_slice %24 {offsets = [0, 0], sizes = [8, 32], strides = [1, 1]} : vector<8x128xf32> to vector<8x32xf32>
    %c8 = arith.constant 8 : index
    %c0_9 = arith.constant 0 : index
    %26 = vector.load %arg3[%c8, %c0_9] : memref<72x128xf32, #tpu.memory_space<vmem>>, vector<32x128xf32>
    %cst_10 = arith.constant dense<0.000000e+00> : vector<8x128xf32>
    %27 = tpu.matmul %25, %26, %cst_10 {dimension_numbers = #tpu.dot_dimension_numbers<[1], [0], [0], [1], [0, 0, 1, 1], [], []>} : vector<8x32xf32>, vector<32x128xf32>, vector<8x128xf32> -> vector<8x128xf32>
    %c1 = arith.constant 1 : index
    %c0_11 = arith.constant 0 : index
    %28 = vector.load %arg4[%c1, %c0_11] : memref<8x128xf32, #tpu.memory_space<vmem>>, vector<1x128xf32>
    %29 = vector.broadcast %28 : vector<1x128xf32> to vector<8x128xf32>
    %30 = arith.addf %27, %29 : vector<8x128xf32>
    %cst_12 = arith.constant 0.000000e+00 : f32
    %31 = vector.broadcast %cst_12 : f32 to vector<8x128xf32>
    %32 = arith.cmpf ogt, %30, %31 : vector<8x128xf32>
    %cst_13 = arith.constant 0.00999999977 : f32
    %33 = vector.broadcast %cst_13 : f32 to vector<8x128xf32>
    %34 = arith.mulf %33, %30 : vector<8x128xf32>
    %35 = arith.select %32, %30, %34 : vector<8x128xi1>, vector<8x128xf32>
    %36 = vector.extract_strided_slice %35 {offsets = [0, 0], sizes = [8, 32], strides = [1, 1]} : vector<8x128xf32> to vector<8x32xf32>
    %c40 = arith.constant 40 : index
    %c0_14 = arith.constant 0 : index
    %37 = vector.load %arg3[%c40, %c0_14] : memref<72x128xf32, #tpu.memory_space<vmem>>, vector<32x128xf32>
    %cst_15 = arith.constant dense<0.000000e+00> : vector<8x128xf32>
    %38 = tpu.matmul %36, %37, %cst_15 {dimension_numbers = #tpu.dot_dimension_numbers<[1], [0], [0], [1], [0, 0, 1, 1], [], []>} : vector<8x32xf32>, vector<32x128xf32>, vector<8x128xf32> -> vector<8x128xf32>
    %c2 = arith.constant 2 : index
    %c0_16 = arith.constant 0 : index
    %39 = vector.load %arg4[%c2, %c0_16] : memref<8x128xf32, #tpu.memory_space<vmem>>, vector<1x128xf32>
    %40 = vector.broadcast %39 : vector<1x128xf32> to vector<8x128xf32>
    %41 = arith.addf %38, %40 : vector<8x128xf32>
    %42 = vector.extract_strided_slice %41 {offsets = [0, 0], sizes = [8, 4], strides = [1, 1]} : vector<8x128xf32> to vector<8x4xf32>
    %43 = arith.subf %42, %2 : vector<8x4xf32>
    %44 = arith.mulf %43, %43 : vector<8x4xf32>
    %cst_17 = arith.constant dense<0.000000e+00> : vector<8xf32>
    %45 = vector.multi_reduction <add>, %44, %cst_17 [1] : vector<8x4xf32> to vector<8xf32>
    %46 = vector.shape_cast %45 : vector<8xf32> to vector<8x1xf32>
    %cst_18 = arith.constant 1.250000e-01 : f32
    %47 = vector.broadcast %cst_18 : f32 to vector<8x1xf32>
    %48 = arith.mulf %46, %47 : vector<8x1xf32>
    %49 = arith.subf %14, %4 : vector<8x4xf32>
    %50 = arith.mulf %49, %49 : vector<8x4xf32>
    %51 = arith.divf %50, %5 : vector<8x4xf32>
    %cst_19 = arith.constant dense<0.000000e+00> : vector<8xf32>
    %52 = vector.multi_reduction <add>, %51, %cst_19 [1] : vector<8x4xf32> to vector<8xf32>
    %53 = vector.shape_cast %52 : vector<8xf32> to vector<8x1xf32>
    %54 = arith.mulf %14, %14 : vector<8x4xf32>
    %cst_20 = arith.constant dense<0.000000e+00> : vector<8xf32>
    %55 = vector.multi_reduction <add>, %54, %cst_20 [1] : vector<8x4xf32> to vector<8xf32>
    %56 = vector.shape_cast %55 : vector<8xf32> to vector<8x1xf32>
    %57 = math.log %5 : vector<8x4xf32>
    %cst_21 = arith.constant dense<0.000000e+00> : vector<8xf32>
    %58 = vector.multi_reduction <add>, %57, %cst_21 [1] : vector<8x4xf32> to vector<8xf32>
    %59 = vector.shape_cast %58 : vector<8xf32> to vector<8x1xf32>
    %cst_22 = arith.constant 0.000000e+00 : f32
    %60 = vector.broadcast %cst_22 : f32 to vector<8x1xf32>
    %61 = arith.subf %60, %59 : vector<8x1xf32>
    %cst_23 = arith.constant 4.000000e+00 : f32
    %62 = vector.broadcast %cst_23 : f32 to vector<8x1xf32>
    %63 = arith.addf %6, %62 : vector<8x1xf32>
    %64 = arith.addf %6, %53 : vector<8x1xf32>
    %65 = math.log %64 : vector<8x1xf32>
    %66 = arith.mulf %63, %65 : vector<8x1xf32>
    %67 = arith.subf %61, %66 : vector<8x1xf32>
    %cst_24 = arith.constant 4.000000e+00 : f32
    %68 = vector.broadcast %cst_24 : f32 to vector<8x1xf32>
    %69 = arith.addf %6, %68 : vector<8x1xf32>
    %70 = arith.addf %6, %56 : vector<8x1xf32>
    %71 = math.log %70 : vector<8x1xf32>
    %72 = arith.mulf %69, %71 : vector<8x1xf32>
    %73 = arith.addf %67, %72 : vector<8x1xf32>
    %cst_25 = arith.constant 1.250000e-01 : f32
    %74 = vector.broadcast %cst_25 : f32 to vector<8x1xf32>
    %75 = arith.mulf %73, %74 : vector<8x1xf32>
    %76 = tpu.iota {dimensions = array<i32: 1>} : vector<8x128xi32>
    %c0_i32 = arith.constant 0 : i32
    %77 = vector.broadcast %c0_i32 : i32 to vector<8x128xi32>
    %78 = arith.cmpi eq, %76, %77 : vector<8x128xi32>
    %c1_i32 = arith.constant 1 : i32
    %79 = vector.broadcast %c1_i32 : i32 to vector<8x128xi32>
    %80 = arith.cmpi eq, %76, %79 : vector<8x128xi32>
    %cst_26 = arith.constant 0.000000e+00 : f32
    %81 = vector.broadcast %cst_26 : f32 to vector<8x128xf32>
    %82 = vector.shape_cast %75 : vector<8x1xf32> to vector<8x1xf32>
    %83 = vector.broadcast %82 : vector<8x1xf32> to vector<8x128xf32>
    %84 = arith.select %80, %83, %81 : vector<8x128xi1>, vector<8x128xf32>
    %85 = vector.shape_cast %48 : vector<8x1xf32> to vector<8x1xf32>
    %86 = vector.broadcast %85 : vector<8x1xf32> to vector<8x128xf32>
    %87 = arith.select %78, %86, %84 : vector<8x128xi1>, vector<8x128xf32>
    %c0_27 = arith.constant 0 : index
    %c0_28 = arith.constant 0 : index
    %88 = vector.load %arg5[%c0_27, %c0_28] : memref<8x128xf32, #tpu.memory_space<vmem>>, vector<8x128xf32>
    tpu.vector_store %arg5[%c0_27, %c0_28], %87 {strides = array<i32>} : memref<8x128xf32, #tpu.memory_space<vmem>>, vector<8x128xf32>,
    return
  }
  func.func @transform_0(%arg0: i32) -> (i32, i32) {
    %c0_i32 = arith.constant 0 : i32
    %c0_i32_0 = arith.constant 0 : i32
    return %arg0, %c0_i32 : i32, i32
  }
  func.func @transform_1(%arg0: i32) -> (i32, i32) {
    %c0_i32 = arith.constant 0 : i32
    %c0_i32_0 = arith.constant 0 : i32
    return %arg0, %c0_i32 : i32, i32
  }
  func.func @transform_2(%arg0: i32) -> (i32, i32) {
    %c0_i32 = arith.constant 0 : i32
    %c0_i32_0 = arith.constant 0 : i32
    %c0_i32_1 = arith.constant 0 : i32
    return %c0_i32, %c0_i32_0 : i32, i32
  }
  func.func @transform_3(%arg0: i32) -> (i32, i32) {
    %c0_i32 = arith.constant 0 : i32
    %c0_i32_0 = arith.constant 0 : i32
    %c0_i32_1 = arith.constant 0 : i32
    return %c0_i32, %c0_i32_0 : i32, i32
  }
  func.func @transform_4(%arg0: i32) -> (i32, i32) {
    %c0_i32 = arith.constant 0 : i32
    %c0_i32_0 = arith.constant 0 : i32
    return %arg0, %c0_i32 : i32, i32
  }
}

</mosaic_0001>

<bundles_post_ra>
// kernel: vae_st_forward.4
= control target key start
LH: loop header
LB: loop body
LE: loop exit
PB: predicated region body
PF: predicated region fallthrough
CT: control target
= control target key end

     0   :  { %vm21_vm0 = vcmask 64512   ;;  %v359_v0 = vmov 0.0   ;;  %vm360_vm1 = vmmov 0   ;;  %v361_v6 = vmov 0.0|0.0   ;;  %s426_s1 = inlined_call_operand.vmem [shape: f32[72,128], index: 1, kind: input, shape index: {}]   ;;  %s427_s0 = inlined_call_operand.vmem [shape: f32[8,128], index: 0, kind: input, shape index: {}]   ;;  %s428_s2 = inlined_call_operand.vmem [shape: f32[8,128], index: 2, kind: input, shape index: {}]   ;;  %s429_s3 = inlined_call_operand.vmem [shape: f32[8,128], index: 3, kind: output, shape index: {}]  }
   0x1   :  { %309 = vmatprep.subr.mxu0 %v359_v0  ;;  %v15_v1 = vld [vmem:[%s426_s1] sm:$0xff]  ;;  %311 = vmatprep.mubr.msk.f32.mxu0 %vm360_vm1, %v359_v0  ;;  %v96_v3 = vld [vmem:[%s426_s1 + $0x8] sm:$0xff]  ;;  %v97_v4 = vld [vmem:[%s426_s1 + $0x10] sm:$0xff]  ;;  %vm105_vm2 = vcmask 261120   ;;  %v277_v37 = vlaneseq }
   0x2   :  { %v14_v2 = vld [vmem:[%s427_s0] sm:$0xff]  ;;  %310 = vmatpush3.msra.mxu0 %v15_v1  ;;  %322 = vmatprep.mubr.msk.f32.mxu1 %vm360_vm1, %v359_v0  ;;  %v98_v5 = vld [vmem:[%s426_s1 + $0x18] sm:$0xff]  ;;  %v337_v7 = vpack.c.bf16 %v97_v4, %v96_v3  ;;  %v180_v15 = vld [vmem:[%s426_s1 + $0x28] sm:$0xff] }
   0x3   :  { %312 = vmatmul.mubr.msk.f32.vlgmr.msra.gmra.mrb[0].mxu0 %vm21_vm0, %v14_v2  ;;  %336 = vmatprep.subr.bf16.mxu1 %v361_v6  ;;  %v99_v8 = vld [vmem:[%s426_s1 + $0x20] sm:$0xff]  ;;  %v181_v16 = vld [vmem:[%s426_s1 + $0x30] sm:$0xff]  ;;  %v182_v17 = vld [vmem:[%s426_s1 + $0x38] sm:$0xff]  ;;  %v278_v42 = vand.u32 127, %v277_v37 }
   0x4   :  { %333 = vmatprep.mubr.msk.f32.mxu0 %vm360_vm1, %v359_v0  ;;  %342 = vmatprep.subr.bf16.mxu0 %v361_v6  ;;  %v340_v9 = vpack.c.bf16 %v99_v8, %v98_v5  ;;  %v291_v10 = vld [vmem:[%s428_s2] ss:$0 sm:$0xff]  ;;  %v343_v18 = vpack.c.bf16 %v181_v16, %v180_v15  ;;  %v293_v21 = vld [vmem:[%s428_s2 + $0x1] ss:$0 sm:$0xff]  ;;  %v295_v26 = vld [vmem:[%s428_s2 + $0x2] ss:$0 sm:$0xff] }
   0x5   :  { %338 = vmatpush3.bf16.msra.mxu1 %v337_v7  ;;  %v183_v19 = vld [vmem:[%s426_s1 + $0x40] sm:$0xff]  ;;  %vm281_vm4 = vcmp.eq.s32.totalorder %v278_v42, 8  ;;  %vm280_vm5 = vcmp.lt.s32.totalorder %v278_v42, 8  ;;  %vm279_vm6 = vcmp.lt.s32.totalorder %v278_v42, 4 }
   0x6   :  { %339 = vmatprep.subr.bf16.mxu1 %v361_v6  ;;  %344 = vmatpush3.bf16.msra.mxu0 %v343_v18  ;;  %v346_v20 = vpack.c.bf16 %v183_v19, %v182_v17 }
   0x7   :  { %345 = vmatprep.subr.bf16.mxu0 %v361_v6 }
   0x9   :  { %341 = vmatpush3.bf16.msra.mxu1 %v340_v9 }
   0xa   :  { %347 = vmatpush3.bf16.msra.mxu0 %v346_v20 }
  0xd6   :  { %v91_v11 = vpop.f32.mrb[0].mxu0 }
  0xd7   :  { %v92_v12 = vadd.f32 %v291_v10, %v91_v11  ;;  %v313_v13 = vpop.f32.mrb[1].mxu0 }
  0xd9   :  { %351 = vtanh.f32 %v92_v12 }
  0xe3   :  { %v352_v14 = vpop.eup %351 }
  0xe4   :  { %323 = vmatmul.mubr.msk.f32.vlgmr.msra.gmra.mrb[0].mxu1 %vm105_vm2, %v352_v14 }
 0x1b7   :  { %v175_v22 = vpop.f32.mrb[0].mxu1 }
 0x1b8   :  { %v176_v23 = vadd.f32 %v293_v21, %v175_v22  ;;  %v324_v24 = vpop.f32.mrb[1].mxu1 }
 0x1ba   :  { %353 = vtanh.f32 %v176_v23 }
 0x1c4   :  { %v354_v25 = vpop.eup %353 }
 0x1c5   :  { %334 = vmatmul.mubr.msk.f32.vlgmr.msra.gmra.mrb[2].mxu0 %vm105_vm2, %v354_v25 }
 0x298   :  { %v258_v27 = vpop.f32.mrb[2].mxu0 }
 0x299   :  { %v259_v28 = vadd.f32 %v295_v26, %v258_v27  ;;  %v335_v29 = vpop.f32.mrb[3].mxu0 }
 0x29b   :  { %v263_v30 = vand.u32 2147483647, %v259_v28  ;;  %v262_v43 = vmax.f32 %v259_v28, 0.0 }
 0x29d   :  { %v264_v31 = vsub.f32 0.0, %v263_v30 }
 0x29f   :  { %v265_v32 = vmul.f32 1.442695, %v264_v31 }
 0x2a1   :  { %355 = vpow2.f32 %v265_v32 }
 0x2ab   :  { %v356_v33 = vpop.eup %355 }
 0x2ac   :  { %v267_v34 = vadd.f32 1.0, %v356_v33  ;;  %v270_v35 = vmul.f32 -0.5, %v356_v33  ;;  %v273_v38 = vand.u32 2147483647, %v356_v33 }
 0x2ae   :  { %357 = vlog2.f32 %v267_v34  ;;  %v271_v36 = vadd.f32 1.0, %v270_v35  ;;  %vm274_vm3 = vcmp.lt.f32.partialorder %v273_v38, 0.0004427343 }
 0x2b0   :  { %v272_v41 = vmul.f32 %v356_v33, %v271_v36 }
 0x2b8   :  { %v358_v39 = vpop.eup %357 }
 0x2b9   :  { %v269_v40 = vmul.f32 0.6931472, %v358_v39 }
 0x2bb   :  { %v275_v44 = vsel %vm274_vm3, %v272_v41, %v269_v40 }
 0x2bc   :  { %v276_v45 = vadd.f32 %v275_v44, %v262_v43 }
 0x2be   :  { %v282_v46 = vadd.f32 3.0, %v276_v45 }
 0x2c0   :  { %v283_v47 = vsel %vm281_vm4, %v282_v46, 0.0 }
 0x2c1   :  { %v284_v48 = vsel %vm280_vm5, %v276_v45, %v283_v47 }
 0x2c2   :  { %v285_v49 = vsel %vm279_vm6, %v259_v28, %v284_v48 }
 0x2c3   :  { %286 = vst [vmem:[%s429_s3] sm:$0xff] %v285_v49 }

// kernel: vae_st_forward.5
= control target key start
LH: loop header
LB: loop body
LE: loop exit
PB: predicated region body
PF: predicated region fallthrough
CT: control target
= control target key end

     0   :  { %v447_v1 = vmov 8   ;;  %s448_s17 = smov 127   ;;  %s449_s20 = smov 124   ;;  %v450_v16 = vmov 0.0   ;;  %vm65_vm3 = vcmask 1043456   ;;  %vm451_vm5 = vmmov 0   ;;  %s556_s1 = inlined_call_operand.vmem [shape: f32[8,128], index: 1, kind: input, shape index: {}]   ;;  %s557_s0 = inlined_call_operand.vmem [shape: f32[8,128], index: 0, kind: input, shape index: {}]   ;;  %s558_s2 = inlined_call_operand.vmem [shape: f32[72,128], index: 2, kind: input, shape index: {}]   ;;  %s559_s3 = inlined_call_operand.vmem [shape: f32[8,128], index: 3, kind: input, shape index: {}]   ;;  %s560_s4 = inlined_call_operand.vmem [shape: f32[8,128], index: 4, kind: output, shape index: {}]  }
   0x1   :  { %v481_v0 = vld [vmem:[%s556_s1] sm:$0xff]  ;;  %432 = vset.pattern.permute.xlu0 %v447_v1  ;;  %387 = vmatprep.subr.mxu0 %v450_v16  ;;  %vm61_vm6 = vcmask 31744   ;;  %v142_v36 = vld [vmem:[%s558_s2 + $0x8] sm:$0xff]  ;;  %v143_v37 = vld [vmem:[%s558_s2 + $0x10] sm:$0xff]  ;;  %v452_v38 = vmov 0.0|0.0   ;;  %vm151_vm8 = vcmask 261120  }
   0x2   :  { %32 = vrot.lane.b32.xlu0 %v481_v0, %s448_s17  ;;  %v487_v2 = vld [vmem:[%s557_s0] sm:$0xff]  ;;  %vm21_vm2 = vcmp.eq.f32.partialorder %v481_v0, inf  ;;  %v24_v15 = vand.u32 2147483648, %v481_v0  ;;  %vm23_vm4 = vcmp.eq.f32.partialorder %v481_v0, 0.0  ;;  %389 = vmatprep.mubr.msk.f32.mxu0 %vm451_vm5, %v450_v16  ;;  %v415_v39 = vpack.c.bf16 %v143_v37, %v142_v36  ;;  %v144_v40 = vld [vmem:[%s558_s2 + $0x18] sm:$0xff]  ;;  %v228_v59 = vld [vmem:[%s558_s2 + $0x28] sm:$0xff] }
   0x3   :  { %27 = vrot.lane.b32.xlu1 %v487_v2, %s449_s20  ;;  %v55_v17 = vld [vmem:[%s558_s2] sm:$0xf]  ;;  %400 = vmatprep.mubr.msk.f32.mxu1 %vm451_vm5, %v450_v16  ;;  %v340_v50 = vadd.f32 4.0, %v481_v0  ;;  %v229_v60 = vld [vmem:[%s558_s2 + $0x30] sm:$0xff] }
   0x4   :  { %388 = vmatpush3.msk.msra.mxu0 %vm65_vm3, %v55_v17  ;;  %414 = vmatprep.subr.bf16.mxu1 %v452_v38  ;;  %v145_v41 = vld [vmem:[%s558_s2 + $0x20] sm:$0xff]  ;;  %v421_v61 = vpack.c.bf16 %v229_v60, %v228_v59 }
   0x5   :  { %420 = vmatprep.subr.bf16.mxu0 %v452_v38  ;;  %416 = vmatpush3.bf16.msra.mxu1 %v415_v39  ;;  %v418_v42 = vpack.c.bf16 %v145_v41, %v144_v40  ;;  %v368_v62 = vld [vmem:[%s559_s3] ss:$0 sm:$0xff] }
   0x6   :  { %417 = vmatprep.subr.bf16.mxu1 %v452_v38 }
   0x9   :  { %419 = vmatpush3.bf16.msra.mxu1 %v418_v42 }
  0x74   :  { %v33_v3 = vpop.permute.xlu0 %32 }
  0x75   :  { %433 = vrcp.f32 %v33_v3  ;;  %v28_v20 = vpop.permute.xlu1 %27 }
  0x7f   :  { %v434_v4 = vpop.eup %433 }
  0x80   :  { %v36_v5 = vmul.f32 %v434_v4, %v481_v0 }
  0x82   :  { %435 = vrsqrt.f32 %v36_v5  ;;  %vm39_vm0 = vcmp.eq.f32.partialorder %v36_v5, inf  ;;  %v42_v8 = vand.u32 2147483648, %v36_v5  ;;  %vm41_vm1 = vcmp.eq.f32.partialorder %v36_v5, 0.0 }
  0x83   :  { %437 = vlog2.f32 %v481_v0 }
  0x84   :  { %439 = vrsqrt.f32 %v481_v0 }
  0x8c   :  { %v436_v6 = vpop.eup %435 }
  0x8d   :  { %v38_v7 = vmul.f32 %v436_v6, %v36_v5  ;;  %v438_v11 = vpop.eup %437  ;;  %v231_v6 = vld [vmem:[%s558_s2 + $0x40] sm:$0xff] }
  0x8e   :  { %v331_v12 = vmul.f32 0.6931472, %v438_v11  ;;  %v440_v13 = vpop.eup %439 }
  0x8f   :  { %v40_v9 = vsel %vm39_vm0, %v36_v5, %v38_v7  ;;  %v20_v14 = vmul.f32 %v440_v13, %v481_v0  ;;  %v230_v5 = vld [vmem:[%s558_s2 + $0x38] sm:$0xff] }
  0x90   :  { %v43_v10 = vsel %vm41_vm1, %v42_v8, %v40_v9  ;;  %v424_v7 = vpack.c.bf16 %v231_v6, %v230_v5  ;;  %v371_v8 = vld [vmem:[%s559_s3 + $0x1] ss:$0 sm:$0xff] }
  0x91   :  { %46 = vperm.xlu0 %432, %v43_v10   ;;  %v22_v18 = vsel %vm21_vm2, %v481_v0, %v20_v14  ;;  %v373_v14 = vld [vmem:[%s559_s3 + $0x2] ss:$0 sm:$0xff] }
  0x92   :  { %v25_v19 = vsel %vm23_vm4, %v24_v15, %v22_v18 }
  0x93   :  { %v30_v21 = vmul.f32 %v28_v20, %v25_v19 }
  0x95   :  { %333 = vrot.lane.b32.xlu0 %v331_v12, %s449_s20 }
 0x110   :  { %v47_v22 = vpop.permute.xlu0 %46 }
 0x111   :  { %v49_v23 = vmul.f32 %v47_v22, %v30_v21  ;;  %v352_v21 = vlaneseq }
 0x113   :  { %51 = vrot.lane.b32.xlu1 %v49_v23, %s449_s20  ;;  %v353_v22 = vand.u32 127, %v352_v21 }
 0x114   :  { %v334_v28 = vpop.permute.xlu0 %333 }
 0x115   :  { %v336_v30 = vsel %vm61_vm6, %v334_v28, 0.0  ;;  %vm355_vm10 = vcmp.eq.s32.totalorder %v353_v22, 1  ;;  %vm354_vm11 = vcmp.eq.s32.totalorder %v353_v22, 0 }
 0x117   :  { %318 = vrot.lane.b32.xlu1 %v481_v0, %s449_s20 }
 0x185   :  { %v52_v24 = vpop.permute.xlu1 %51 }
 0x186   :  { %v54_v25 = vadd.f32 %v52_v24, %v481_v0 }
 0x188   :  { %390 = vmatmul.mubr.msk.f32.vlgmr.msra.gmra.mrb[0].mxu0 %vm61_vm6, %v54_v25  ;;  %v326_v26 = vmul.f32 %v54_v25, %v54_v25  ;;  %v316_v31 = vsub.f32 %v54_v25, %v481_v0 }
 0x189   :  { %v319_v27 = vpop.permute.xlu1 %318  ;;  %411 = vmatprep.mubr.msk.f32.mxu0 %vm451_vm5, %v450_v16  ;;  %422 = vmatpush3.bf16.msra.mxu0 %v421_v61 }
 0x18a   :  { %441 = vrcp.f32 %v319_v27  ;;  %v327_v29 = vsel %vm61_vm6, %v326_v26, 0.0  ;;  %v317_v32 = vmul.f32 %v316_v31, %v316_v31  ;;  %423 = vmatprep.subr.bf16.mxu0 %v452_v38 }
 0x18b   :  { %328 = vadd.xlane.f32.xlu0 %v327_v29 }
 0x18d   :  { %425 = vmatpush3.bf16.msra.mxu0 %v424_v7 }
 0x18f   :  { %337 = vadd.xlane.f32.xlu0 %v336_v30 }
 0x194   :  { %v442_v33 = vpop.eup %441 }
 0x195   :  { %v322_v34 = vmul.f32 %v442_v33, %v317_v32 }
 0x197   :  { %v323_v35 = vsel %vm61_vm6, %v322_v34, 0.0 }
 0x198   :  { %324 = vadd.xlane.f32.xlu1 %v323_v35 }
 0x218   :  { %v329_v43 = vpop.xlane.xlu0 %328 }
 0x219   :  { %v346_v44 = vadd.f32 %v329_v43, %v481_v0 }
 0x21b   :  { %443 = vlog2.f32 %v346_v44 }
 0x21c   :  { %v338_v48 = vpop.xlane.xlu0 %337 }
 0x21d   :  { %v339_v53 = vsub.f32 0.0, %v338_v48 }
 0x225   :  { %v325_v45 = vpop.xlane.xlu1 %324  ;;  %v444_v47 = vpop.eup %443 }
 0x226   :  { %v341_v46 = vadd.f32 %v325_v45, %v481_v0  ;;  %v348_v51 = vmul.f32 0.6931472, %v444_v47 }
 0x228   :  { %445 = vlog2.f32 %v341_v46  ;;  %v349_v55 = vmul.f32 %v348_v51, %v340_v50 }
 0x232   :  { %v446_v49 = vpop.eup %445 }
 0x233   :  { %v343_v52 = vmul.f32 0.6931472, %v446_v49 }
 0x235   :  { %v344_v54 = vmul.f32 %v343_v52, %v340_v50 }
 0x237   :  { %v345_v56 = vsub.f32 %v339_v53, %v344_v54 }
 0x239   :  { %v350_v57 = vadd.f32 %v349_v55, %v345_v56 }
 0x23b   :  { %v351_v58 = vmul.f32 0.125, %v350_v57 }
 0x23d   :  { %358 = vperm.xlu0 %432, %v351_v58  }
 0x25b   :  { %v135_v63 = vpop.f32.mrb[0].mxu0 }
 0x25c   :  { %v136_v0 = vadd.f32 %v368_v62, %v135_v63  ;;  %v391_v1 = vpop.f32.mrb[1].mxu0 }
 0x25e   :  { %vm139_vm7 = vcmp.gt.f32.partialorder %v136_v0, 0.0  ;;  %v140_v3 = vmul.f32 0.01, %v136_v0 }
 0x260   :  { %v141_v4 = vsel %vm139_vm7, %v136_v0, %v140_v3 }
 0x261   :  { %401 = vmatmul.mubr.msk.f32.vlgmr.msra.gmra.mrb[0].mxu1 %vm151_vm8, %v141_v4 }
 0x2bc   :  { %v359_v23 = vpop.permute.xlu0 %358 }
 0x2bd   :  { %v361_v26 = vsel %vm355_vm10, %v359_v23, 0.0 }
 0x334   :  { %v221_v9 = vpop.f32.mrb[0].mxu1 }
 0x335   :  { %v222_v10 = vadd.f32 %v371_v8, %v221_v9  ;;  %v402_v11 = vpop.f32.mrb[1].mxu1 }
 0x337   :  { %vm225_vm9 = vcmp.gt.f32.partialorder %v222_v10, 0.0  ;;  %v226_v12 = vmul.f32 0.01, %v222_v10 }
 0x339   :  { %v227_v13 = vsel %vm225_vm9, %v222_v10, %v226_v12 }
 0x33a   :  { %412 = vmatmul.mubr.msk.f32.vlgmr.msra.gmra.mrb[2].mxu0 %vm151_vm8, %v227_v13 }
 0x40d   :  { %v306_v15 = vpop.f32.mrb[2].mxu0 }
 0x40e   :  { %v307_v16 = vadd.f32 %v373_v14, %v306_v15  ;;  %v413_v17 = vpop.f32.mrb[3].mxu0 }
 0x410   :  { %v310_v18 = vsub.f32 %v307_v16, %v487_v2 }
 0x412   :  { %v311_v19 = vmul.f32 %v310_v18, %v310_v18 }
 0x414   :  { %v312_v20 = vsel %vm61_vm6, %v311_v19, 0.0 }
 0x415   :  { %313 = vadd.xlane.f32.xlu1 %v312_v20 }
 0x4a2   :  { %v314_v24 = vpop.xlane.xlu1 %313 }
 0x4a3   :  { %v315_v25 = vmul.f32 0.125, %v314_v24 }
 0x4a5   :  { %v362_v27 = vsel %vm354_vm11, %v315_v25, %v361_v26 }
 0x4a6   :  { %363 = vst [vmem:[%s560_s4] sm:$0xff] %v362_v27 }

</bundles_post_ra>
